<compile_context>
chip_gen: v7x
topology: tpu7x:2x2x1
jax: 0.10.0
libtpu: 0.0.40
codegen_flags: <defaults>
</compile_context>

<pallas_src>
import jax
import jax.numpy as jnp
import numpy as np
from jax.experimental import pallas as pl
from jax.experimental.pallas import tpu as pltpu

_EPS_BN = 1e-5
_EPS_LN = 1e-5


# --------------------------------------------------------------------------
# Pallas kernel: whole forward pass for one batch tile of TB rows.
# --------------------------------------------------------------------------
def _simple_model_kernel(
    tag_idx_ref, qcls_idx_ref, ques_idx_ref,    # (TB, 1) int32 row ids
    rate_tag_ref, rate_qcls_ref,                # (TB, 2) f32
    tag_tbl_ref, qcls_tbl_ref, ques_tbl_ref,    # (n_*, H) embedding tables (VMEM-resident)
    w_rt_ref, b_rt_ref,                         # (2, H), (1, H)   eval-BN folded in
    ln_tag_g_ref, ln_tag_b_ref,                 # (1, H)
    w_rq_ref, b_rq_ref,                         # (2, H), (1, H)   eval-BN folded in
    ln_qcls_g_ref, ln_qcls_b_ref,               # (1, H)
    w_cb_ref, b_cb_ref,                         # (2H, H), (1, H)
    ln_know_g_ref, ln_know_b_ref,               # (1, H)
    w_fc_ref,                                   # (1, H) final fc row (weight-normed)
    scalars_ref,                                # SMEM (2,): [prelu_a, fc_bias]
    out_ref,                                    # (TB, 1)
):
    H = w_rt_ref.shape[1]
    a = scalars_ref[0]
    b_fc = scalars_ref[1]

    def prelu(x):
        return jnp.where(x >= 0, x, a * x)

    def layer_norm(x, g, b):
        mu = jnp.mean(x, axis=-1, keepdims=True)
        var = jnp.mean(jnp.square(x - mu), axis=-1, keepdims=True)
        return (x - mu) * jax.lax.rsqrt(var + _EPS_LN) * g + b

    def gather(tbl_ref, idx_ref):
        # In-kernel embedding row gather via exact one-hot @ table matmul.
        # Tables are tiny and stay in VMEM across the grid, so there is no
        # per-row HBM traffic and no wrapper-side (B, H) materialisation.
        # TODO(synk): for very large vocabularies switch to a DMA/row gather.
        tbl = tbl_ref[...]
        n = tbl.shape[0]
        idx = idx_ref[...]                                          # (TB, 1) int32
        onehot = (jax.lax.broadcasted_iota(jnp.int32, (idx.shape[0], n), 1)
                  == idx).astype(tbl.dtype)                         # (TB, n)
        return jnp.dot(onehot, tbl, preferred_element_type=jnp.float32)

    def rate_linear(rate, w, b):
        # K=2 contraction as two VPU broadcast FMAs (skip the MXU entirely).
        return rate[:, 0:1] * w[0:1, :] + rate[:, 1:2] * w[1:2, :] + b

    # --- KnowledgeTag branch --------------------------------------------------
    rt = rate_linear(rate_tag_ref[...], w_rt_ref[...], b_rt_ref[...])
    rt = prelu(layer_norm(rt, ln_tag_g_ref[...], ln_tag_b_ref[...]))
    embed_tag = gather(tag_tbl_ref, tag_idx_ref) * rt               # (TB, H)

    # --- question-class branch ------------------------------------------------
    rq = rate_linear(rate_qcls_ref[...], w_rq_ref[...], b_rq_ref[...])
    rq = prelu(layer_norm(rq, ln_qcls_g_ref[...], ln_qcls_b_ref[...]))
    embed_qcls = gather(qcls_tbl_ref, qcls_idx_ref) * rq            # (TB, H)

    # --- combine: cat([tag, qcls], -1) @ W == tag @ W[:H] + qcls @ W[H:] ------
    ek = (jnp.dot(embed_tag, w_cb_ref[0:H, :], preferred_element_type=jnp.float32)
          + jnp.dot(embed_qcls, w_cb_ref[H:2 * H, :], preferred_element_type=jnp.float32)
          + b_cb_ref[...])
    ek = prelu(layer_norm(ek, ln_know_g_ref[...], ln_know_b_ref[...]))

    # --- question mask + final fc (VPU multiply + XLU lane reduce) ------------
    mask = jax.nn.sigmoid(gather(ques_tbl_ref, ques_idx_ref))       # (TB, H)
    out = mask * ek
    logit = jnp.sum(out * w_fc_ref[...], axis=-1, keepdims=True) + b_fc
    out_ref[...] = jax.nn.sigmoid(logit)


# --------------------------------------------------------------------------
# Parameter folding helpers (plain JAX, runs once per call).
# --------------------------------------------------------------------------
def _weight_norm(v, g):
    # PyTorch nn.utils.weight_norm default dim=0: norm over all dims except 0.
    return g * v / jnp.linalg.norm(v, axis=1, keepdims=True)


def _bn_eval_fold(gamma, beta, running_mean, running_var):
    scale = gamma / jnp.sqrt(running_var + _EPS_BN)
    shift = beta - running_mean * scale
    return scale, shift


def simple_model_forward(params, inputs, *, tb=8):
    (tag_total, tag_acc, qcls_total, qcls_acc, question, tag, qclass) = inputs
    B = qclass.shape[0]
    H = params["emb_tag"].shape[1]
    f32 = jnp.float32

    rate_tag = jnp.stack([tag_total, tag_acc], axis=1).astype(f32)       # (B, 2)
    rate_qcls = jnp.stack([qcls_total, qcls_acc], axis=1).astype(f32)    # (B, 2)

    # Fold eval-mode BatchNorm1d(2) into the weight-normed Linear(2, H):
    #   (x*scale + shift) @ W + b  ==  x @ (scale[:,None]*W) + (shift @ W + b)
    bn_t_scale, bn_t_shift = _bn_eval_fold(*params["bn_tag"])
    bn_q_scale, bn_q_shift = _bn_eval_fold(*params["bn_qclass"])

    w_rt = _weight_norm(params["rate_tag_v"], params["rate_tag_g"]).T    # (2, H)
    w_rq = _weight_norm(params["rate_qcls_v"], params["rate_qcls_g"]).T  # (2, H)
    w_rt_eff = bn_t_scale[:, None] * w_rt
    b_rt_eff = (bn_t_shift[None, :] @ w_rt) + params["rate_tag_b"][None, :]
    w_rq_eff = bn_q_scale[:, None] * w_rq
    b_rq_eff = (bn_q_shift[None, :] @ w_rq) + params["rate_qcls_b"][None, :]

    w_cb = _weight_norm(params["comb_v"], params["comb_g"]).T            # (2H, H)
    b_cb = params["comb_b"][None, :]
    w_fc_row = _weight_norm(params["fc_v"], params["fc_g"])              # (1, H)
    scalars = jnp.stack([params["prelu_a"][0], params["fc_b"][0]]).astype(f32)

    tag_idx = tag.astype(jnp.int32)[:, None]
    qcls_idx = qclass.astype(jnp.int32)[:, None]
    ques_idx = question.astype(jnp.int32)[:, None]

    # Pad the batch to a multiple of the batch tile (sliced off at the end).
    pad = (-B) % tb
    if pad:
        tag_idx = jnp.pad(tag_idx, ((0, pad), (0, 0)))
        qcls_idx = jnp.pad(qcls_idx, ((0, pad), (0, 0)))
        ques_idx = jnp.pad(ques_idx, ((0, pad), (0, 0)))
        rate_tag = jnp.pad(rate_tag, ((0, pad), (0, 0)))
        rate_qcls = jnp.pad(rate_qcls, ((0, pad), (0, 0)))
    Bp = B + pad

    tables = [params["emb_tag"].astype(f32),
              params["emb_qclass"].astype(f32),
              params["emb_question"].astype(f32)]
    weights = [w_rt_eff, b_rt_eff,
               params["ln_tag_g"][None, :], params["ln_tag_b"][None, :],
               w_rq_eff, b_rq_eff,
               params["ln_qcls_g"][None, :], params["ln_qcls_b"][None, :],
               w_cb, b_cb,
               params["ln_know_g"][None, :], params["ln_know_b"][None, :],
               w_fc_row]
    weights = [w.astype(f32) for w in weights]

    def row_spec(c):                       # batch-tiled per-row arrays
        return pl.BlockSpec((tb, c), lambda i: (i, 0))

    def full_spec(shape):                  # weights/tables: same block every step
        return pl.BlockSpec(shape, lambda i: (0,) * len(shape))

    in_specs = (
        [row_spec(1), row_spec(1), row_spec(1), row_spec(2), row_spec(2)]
        + [full_spec(t.shape) for t in tables]
        + [full_spec(w.shape) for w in weights]
        + [pl.BlockSpec(memory_space=pltpu.MemorySpace.SMEM)]          # scalars
    )

    preds = pl.pallas_call(
        _simple_model_kernel,
        out_shape=jax.ShapeDtypeStruct((Bp, 1), jnp.float32),
        grid=(Bp // tb,),
        in_specs=in_specs,
        out_specs=row_spec(1),
        compiler_params=pltpu.CompilerParams(
            dimension_semantics=("parallel",)),
    )(tag_idx, qcls_idx, ques_idx, rate_tag, rate_qcls, *tables, *weights, scalars)

    # preds.view(batch_size, -1)
    return preds[:B].reshape(B, -1)


# --------------------------------------------------------------------------
# Pure-JAX reference of the PyTorch forward (eval mode) for verification.
# --------------------------------------------------------------------------
def reference_forward(params, inputs):
    (tag_total, tag_acc, qcls_total, qcls_acc, question, tag, qclass) = inputs
    a = params["prelu_a"][0]

    def prelu(x):
        return jnp.where(x >= 0, x, a * x)

    def ln(x, g, b):
        mu = jnp.mean(x, axis=-1, keepdims=True)
        var = jnp.mean(jnp.square(x - mu), axis=-1, keepdims=True)
        return (x - mu) / jnp.sqrt(var + _EPS_LN) * g + b

    def bn_eval(x, p):
        gamma, beta, rm, rv = p
        return (x - rm) / jnp.sqrt(rv + _EPS_BN) * gamma + beta

    def lin_wn(x, v, g, b):
        return x @ _weight_norm(v, g).T + b

    e_tag = params["emb_tag"][tag]
    rate_tag = jnp.stack([tag_total, tag_acc], axis=1)
    rt = bn_eval(rate_tag, params["bn_tag"])
    rt = lin_wn(rt, params["rate_tag_v"], params["rate_tag_g"], params["rate_tag_b"])
    rt = prelu(ln(rt, params["ln_tag_g"], params["ln_tag_b"]))
    e_tag = e_tag * rt

    e_qcls = params["emb_qclass"][qclass]
    rate_qcls = jnp.stack([qcls_total, qcls_acc], axis=1)
    rq = bn_eval(rate_qcls, params["bn_qclass"])
    rq = lin_wn(rq, params["rate_qcls_v"], params["rate_qcls_g"], params["rate_qcls_b"])
    rq = prelu(ln(rq, params["ln_qcls_g"], params["ln_qcls_b"]))
    e_qcls = e_qcls * rq

    ek = jnp.concatenate([e_tag, e_qcls], axis=1)
    ek = lin_wn(ek, params["comb_v"], params["comb_g"], params["comb_b"])
    ek = prelu(ln(ek, params["ln_know_g"], params["ln_know_b"]))

    e_q = params["emb_question"][question]
    mask = jax.nn.sigmoid(e_q)
    out = mask * ek
    out = lin_wn(out, params["fc_v"], params["fc_g"], params["fc_b"])
    return jax.nn.sigmoid(out).reshape(len(qclass), -1)


# --------------------------------------------------------------------------
if __name__ == "__main__":
    B, H = 16, 128                       # lane-dense hidden dim; 2 batch tiles of 8
    n_tag, n_class, n_questions = 16, 8, 64

    key = jax.random.PRNGKey(0)
    ks = iter(jax.random.split(key, 64))

    def nrm(shape, scale=1.0):
        return scale * jax.random.normal(next(ks), shape, dtype=jnp.float32)

    params = {
        "emb_tag": nrm((n_tag, H)),
        "emb_qclass": nrm((n_class, H)),
        "emb_question": nrm((n_questions, H)),
        # BatchNorm1d(2): (gamma, beta, running_mean, running_var)
        "bn_tag": (nrm((2,), 0.5) + 1.0, nrm((2,), 0.1),
                   nrm((2,), 0.1), jnp.abs(nrm((2,), 0.5)) + 0.5),
        "bn_qclass": (nrm((2,), 0.5) + 1.0, nrm((2,), 0.1),
                      nrm((2,), 0.1), jnp.abs(nrm((2,), 0.5)) + 0.5),
        # weight_norm(Linear(2, H)): v (H, 2), g (H, 1), bias (H,)
        "rate_tag_v": nrm((H, 2)), "rate_tag_g": jnp.abs(nrm((H, 1))) + 0.5,
        "rate_tag_b": nrm((H,), 0.1),
        "ln_tag_g": nrm((H,), 0.1) + 1.0, "ln_tag_b": nrm((H,), 0.1),
        "rate_qcls_v": nrm((H, 2)), "rate_qcls_g": jnp.abs(nrm((H, 1))) + 0.5,
        "rate_qcls_b": nrm((H,), 0.1),
        "ln_qcls_g": nrm((H,), 0.1) + 1.0, "ln_qcls_b": nrm((H,), 0.1),
        # weight_norm(Linear(2H, H))
        "comb_v": nrm((H, 2 * H), 0.2), "comb_g": jnp.abs(nrm((H, 1))) + 0.5,
        "comb_b": nrm((H,), 0.1),
        "ln_know_g": nrm((H,), 0.1) + 1.0, "ln_know_b": nrm((H,), 0.1),
        "prelu_a": jnp.array([0.25], dtype=jnp.float32),
        # weight_norm(Linear(H, 1))
        "fc_v": nrm((1, H), 0.3), "fc_g": jnp.abs(nrm((1, 1))) + 0.5,
        "fc_b": nrm((1,), 0.1),
    }

    # Model inputs (the positions of the torch `input` tuple that are used).
    tag_total = jax.random.uniform(next(ks), (B,), dtype=jnp.float32) * 10.0
    tag_acc = jax.random.uniform(next(ks), (B,), dtype=jnp.float32)
    qcls_total = jax.random.uniform(next(ks), (B,), dtype=jnp.float32) * 10.0
    qcls_acc = jax.random.uniform(next(ks), (B,), dtype=jnp.float32)
    question = jax.random.randint(next(ks), (B,), 0, n_questions, dtype=jnp.int32)
    tag = jax.random.randint(next(ks), (B,), 0, n_tag, dtype=jnp.int32)
    qclass = jax.random.randint(next(ks), (B,), 0, n_class, dtype=jnp.int32)
    inputs = (tag_total, tag_acc, qcls_total, qcls_acc, question, tag, qclass)

    preds = jax.block_until_ready(simple_model_forward(params, inputs, tb=8))
    ref = jax.block_until_ready(reference_forward(params, inputs))

    np.testing.assert_allclose(np.asarray(preds), np.asarray(ref),
                               rtol=1e-4, atol=1e-5)
    assert preds.shape == (B, 1)
    print("KERNEL_OK")
</pallas_src>

<mosaic_0001>
module attributes {stable_mosaic.version = 11 : i64} {
  func.func @_simple_model_kernel(%arg0: i32, %arg1: memref<8x1xi32, #tpu.memory_space<vmem>>, %arg2: memref<8x1xi32, #tpu.memory_space<vmem>>, %arg3: memref<8x1xi32, #tpu.memory_space<vmem>>, %arg4: memref<8x2xf32, #tpu.memory_space<vmem>>, %arg5: memref<8x2xf32, #tpu.memory_space<vmem>>, %arg6: memref<16x128xf32, #tpu.memory_space<vmem>>, %arg7: memref<8x128xf32, #tpu.memory_space<vmem>>, %arg8: memref<64x128xf32, #tpu.memory_space<vmem>>, %arg9: memref<2x128xf32, #tpu.memory_space<vmem>>, %arg10: memref<1x128xf32, #tpu.memory_space<vmem>>, %arg11: memref<1x128xf32, #tpu.memory_space<vmem>>, %arg12: memref<1x128xf32, #tpu.memory_space<vmem>>, %arg13: memref<2x128xf32, #tpu.memory_space<vmem>>, %arg14: memref<1x128xf32, #tpu.memory_space<vmem>>, %arg15: memref<1x128xf32, #tpu.memory_space<vmem>>, %arg16: memref<1x128xf32, #tpu.memory_space<vmem>>, %arg17: memref<256x128xf32, #tpu.memory_space<vmem>>, %arg18: memref<1x128xf32, #tpu.memory_space<vmem>>, %arg19: memref<1x128xf32, #tpu.memory_space<vmem>>, %arg20: memref<1x128xf32, #tpu.memory_space<vmem>>, %arg21: memref<1x128xf32, #tpu.memory_space<vmem>>, %arg22: memref<2xf32, #tpu.memory_space<smem>>, %arg23: memref<8x1xf32, #tpu.memory_space<vmem>>) attributes {dimension_semantics = [#tpu.dimension_semantics<parallel>], iteration_bounds = array<i64: 2>, scalar_prefetch = 0 : i64, scratch_operands = 0 : i64, tpu.core_type = #tpu.core_type<tc>, window_params = [{transform_indices = @transform_0, window_bounds = array<i64: 8, 1>}, {transform_indices = @transform_1, window_bounds = array<i64: 8, 1>}, {transform_indices = @transform_2, window_bounds = array<i64: 8, 1>}, {transform_indices = @transform_3, window_bounds = array<i64: 8, 2>}, {transform_indices = @transform_4, window_bounds = array<i64: 8, 2>}, {pipeline_mode = #tpu.pipeline_mode<synchronous>, transform_indices = @transform_5, window_bounds = array<i64: 16, 128>}, {pipeline_mode = #tpu.pipeline_mode<synchronous>, transform_indices = @transform_6, window_bounds = array<i64: 8, 128>}, {pipeline_mode = #tpu.pipeline_mode<synchronous>, transform_indices = @transform_7, window_bounds = array<i64: 64, 128>}, {pipeline_mode = #tpu.pipeline_mode<synchronous>, transform_indices = @transform_8, window_bounds = array<i64: 2, 128>}, {pipeline_mode = #tpu.pipeline_mode<synchronous>, transform_indices = @transform_9, window_bounds = array<i64: 1, 128>}, {pipeline_mode = #tpu.pipeline_mode<synchronous>, transform_indices = @transform_10, window_bounds = array<i64: 1, 128>}, {pipeline_mode = #tpu.pipeline_mode<synchronous>, transform_indices = @transform_11, window_bounds = array<i64: 1, 128>}, {pipeline_mode = #tpu.pipeline_mode<synchronous>, transform_indices = @transform_12, window_bounds = array<i64: 2, 128>}, {pipeline_mode = #tpu.pipeline_mode<synchronous>, transform_indices = @transform_13, window_bounds = array<i64: 1, 128>}, {pipeline_mode = #tpu.pipeline_mode<synchronous>, transform_indices = @transform_14, window_bounds = array<i64: 1, 128>}, {pipeline_mode = #tpu.pipeline_mode<synchronous>, transform_indices = @transform_15, window_bounds = array<i64: 1, 128>}, {pipeline_mode = #tpu.pipeline_mode<synchronous>, transform_indices = @transform_16, window_bounds = array<i64: 256, 128>}, {pipeline_mode = #tpu.pipeline_mode<synchronous>, transform_indices = @transform_17, window_bounds = array<i64: 1, 128>}, {pipeline_mode = #tpu.pipeline_mode<synchronous>, transform_indices = @transform_18, window_bounds = array<i64: 1, 128>}, {pipeline_mode = #tpu.pipeline_mode<synchronous>, transform_indices = @transform_19, window_bounds = array<i64: 1, 128>}, {pipeline_mode = #tpu.pipeline_mode<synchronous>, transform_indices = @transform_20, window_bounds = array<i64: 1, 128>}, {transform_indices = @transform_21, window_bounds = array<i64: 2>}, {transform_indices = @transform_22, window_bounds = array<i64: 8, 1>}]} {
    %c0 = arith.constant 0 : index
    %0 = memref.load %arg22[%c0] : memref<2xf32, #tpu.memory_space<smem>>
    %c1 = arith.constant 1 : index
    %1 = memref.load %arg22[%c1] : memref<2xf32, #tpu.memory_space<smem>>
    %c0_0 = arith.constant 0 : index
    %c0_1 = arith.constant 0 : index
    %2 = vector.load %arg4[%c0_0, %c0_1] : memref<8x2xf32, #tpu.memory_space<vmem>>, vector<8x2xf32>
    %c0_2 = arith.constant 0 : index
    %c0_3 = arith.constant 0 : index
    %3 = vector.load %arg9[%c0_2, %c0_3] : memref<2x128xf32, #tpu.memory_space<vmem>>, vector<2x128xf32>
    %c0_4 = arith.constant 0 : index
    %c0_5 = arith.constant 0 : index
    %4 = vector.load %arg10[%c0_4, %c0_5] : memref<1x128xf32, #tpu.memory_space<vmem>>, vector<1x128xf32>
    %5 = vector.extract_strided_slice %2 {offsets = [0, 0], sizes = [8, 1], strides = [1, 1]} : vector<8x2xf32> to vector<8x1xf32>
    %6 = vector.extract_strided_slice %3 {offsets = [0, 0], sizes = [1, 128], strides = [1, 1]} : vector<2x128xf32> to vector<1x128xf32>
    %7 = vector.broadcast %5 : vector<8x1xf32> to vector<8x128xf32>
    %8 = vector.broadcast %6 : vector<1x128xf32> to vector<8x128xf32>
    %9 = arith.mulf %7, %8 : vector<8x128xf32>
    %10 = vector.extract_strided_slice %2 {offsets = [0, 1], sizes = [8, 1], strides = [1, 1]} : vector<8x2xf32> to vector<8x1xf32>
    %11 = vector.extract_strided_slice %3 {offsets = [1, 0], sizes = [1, 128], strides = [1, 1]} : vector<2x128xf32> to vector<1x128xf32>
    %12 = vector.broadcast %10 : vector<8x1xf32> to vector<8x128xf32>
    %13 = vector.broadcast %11 : vector<1x128xf32> to vector<8x128xf32>
    %14 = arith.mulf %12, %13 : vector<8x128xf32>
    %15 = arith.addf %9, %14 : vector<8x128xf32>
    %16 = vector.broadcast %4 : vector<1x128xf32> to vector<8x128xf32>
    %17 = arith.addf %15, %16 : vector<8x128xf32>
    %c0_6 = arith.constant 0 : index
    %c0_7 = arith.constant 0 : index
    %18 = vector.load %arg11[%c0_6, %c0_7] : memref<1x128xf32, #tpu.memory_space<vmem>>, vector<1x128xf32>
    %c0_8 = arith.constant 0 : index
    %c0_9 = arith.constant 0 : index
    %19 = vector.load %arg12[%c0_8, %c0_9] : memref<1x128xf32, #tpu.memory_space<vmem>>, vector<1x128xf32>
    %cst = arith.constant dense<0.000000e+00> : vector<8xf32>
    %20 = vector.multi_reduction <add>, %17, %cst [1] : vector<8x128xf32> to vector<8xf32>
    %21 = vector.shape_cast %20 : vector<8xf32> to vector<8x1xf32>
    %cst_10 = arith.constant 1.280000e+02 : f32
    %22 = vector.broadcast %cst_10 : f32 to vector<8x1xf32>
    %23 = arith.divf %21, %22 : vector<8x1xf32>
    %24 = vector.broadcast %23 : vector<8x1xf32> to vector<8x128xf32>
    %25 = arith.subf %17, %24 : vector<8x128xf32>
    %26 = arith.mulf %25, %25 : vector<8x128xf32>
    %cst_11 = arith.constant dense<0.000000e+00> : vector<8xf32>
    %27 = vector.multi_reduction <add>, %26, %cst_11 [1] : vector<8x128xf32> to vector<8xf32>
    %28 = vector.shape_cast %27 : vector<8xf32> to vector<8x1xf32>
    %cst_12 = arith.constant 1.280000e+02 : f32
    %29 = vector.broadcast %cst_12 : f32 to vector<8x1xf32>
    %30 = arith.divf %28, %29 : vector<8x1xf32>
    %31 = vector.broadcast %23 : vector<8x1xf32> to vector<8x128xf32>
    %32 = arith.subf %17, %31 : vector<8x128xf32>
    %cst_13 = arith.constant 9.99999974E-6 : f32
    %33 = vector.broadcast %cst_13 : f32 to vector<8x1xf32>
    %34 = arith.addf %30, %33 : vector<8x1xf32>
    %35 = math.rsqrt %34 : vector<8x1xf32>
    %36 = vector.broadcast %35 : vector<8x1xf32> to vector<8x128xf32>
    %37 = arith.mulf %32, %36 : vector<8x128xf32>
    %38 = vector.broadcast %18 : vector<1x128xf32> to vector<8x128xf32>
    %39 = arith.mulf %37, %38 : vector<8x128xf32>
    %40 = vector.broadcast %19 : vector<1x128xf32> to vector<8x128xf32>
    %41 = arith.addf %39, %40 : vector<8x128xf32>
    %cst_14 = arith.constant 0.000000e+00 : f32
    %42 = vector.broadcast %cst_14 : f32 to vector<8x128xf32>
    %43 = arith.cmpf oge, %41, %42 : vector<8x128xf32>
    %44 = vector.broadcast %0 : f32 to vector<8x128xf32>
    %45 = arith.mulf %44, %41 : vector<8x128xf32>
    %46 = arith.select %43, %41, %45 : vector<8x128xi1>, vector<8x128xf32>
    %c0_15 = arith.constant 0 : index
    %c0_16 = arith.constant 0 : index
    %47 = vector.load %arg6[%c0_15, %c0_16] : memref<16x128xf32, #tpu.memory_space<vmem>>, vector<16x128xf32>
    %c0_17 = arith.constant 0 : index
    %c0_18 = arith.constant 0 : index
    %48 = vector.load %arg1[%c0_17, %c0_18] : memref<8x1xi32, #tpu.memory_space<vmem>>, vector<8x1xi32>
    %49 = tpu.iota {dimensions = array<i32: 1>} : vector<8x16xi32>
    %50 = vector.broadcast %48 : vector<8x1xi32> to vector<8x16xi32>
    %51 = arith.cmpi eq, %49, %50 : vector<8x16xi32>
    %52 = arith.extui %51 : vector<8x16xi1> to vector<8x16xi32>
    %53 = arith.sitofp %52 : vector<8x16xi32> to vector<8x16xf32>
    %cst_19 = arith.constant dense<0.000000e+00> : vector<8x128xf32>
    %54 = tpu.matmul %53, %47, %cst_19 {dimension_numbers = #tpu.dot_dimension_numbers<[1], [0], [0], [1], [0, 0, 1, 1], [], []>} : vector<8x16xf32>, vector<16x128xf32>, vector<8x128xf32> -> vector<8x128xf32>
    %55 = arith.mulf %54, %46 : vector<8x128xf32>
    %c0_20 = arith.constant 0 : index
    %c0_21 = arith.constant 0 : index
    %56 = vector.load %arg5[%c0_20, %c0_21] : memref<8x2xf32, #tpu.memory_space<vmem>>, vector<8x2xf32>
    %c0_22 = arith.constant 0 : index
    %c0_23 = arith.constant 0 : index
    %57 = vector.load %arg13[%c0_22, %c0_23] : memref<2x128xf32, #tpu.memory_space<vmem>>, vector<2x128xf32>
    %c0_24 = arith.constant 0 : index
    %c0_25 = arith.constant 0 : index
    %58 = vector.load %arg14[%c0_24, %c0_25] : memref<1x128xf32, #tpu.memory_space<vmem>>, vector<1x128xf32>
    %59 = vector.extract_strided_slice %56 {offsets = [0, 0], sizes = [8, 1], strides = [1, 1]} : vector<8x2xf32> to vector<8x1xf32>
    %60 = vector.extract_strided_slice %57 {offsets = [0, 0], sizes = [1, 128], strides = [1, 1]} : vector<2x128xf32> to vector<1x128xf32>
    %61 = vector.broadcast %59 : vector<8x1xf32> to vector<8x128xf32>
    %62 = vector.broadcast %60 : vector<1x128xf32> to vector<8x128xf32>
    %63 = arith.mulf %61, %62 : vector<8x128xf32>
    %64 = vector.extract_strided_slice %56 {offsets = [0, 1], sizes = [8, 1], strides = [1, 1]} : vector<8x2xf32> to vector<8x1xf32>
    %65 = vector.extract_strided_slice %57 {offsets = [1, 0], sizes = [1, 128], strides = [1, 1]} : vector<2x128xf32> to vector<1x128xf32>
    %66 = vector.broadcast %64 : vector<8x1xf32> to vector<8x128xf32>
    %67 = vector.broadcast %65 : vector<1x128xf32> to vector<8x128xf32>
    %68 = arith.mulf %66, %67 : vector<8x128xf32>
    %69 = arith.addf %63, %68 : vector<8x128xf32>
    %70 = vector.broadcast %58 : vector<1x128xf32> to vector<8x128xf32>
    %71 = arith.addf %69, %70 : vector<8x128xf32>
    %c0_26 = arith.constant 0 : index
    %c0_27 = arith.constant 0 : index
    %72 = vector.load %arg15[%c0_26, %c0_27] : memref<1x128xf32, #tpu.memory_space<vmem>>, vector<1x128xf32>
    %c0_28 = arith.constant 0 : index
    %c0_29 = arith.constant 0 : index
    %73 = vector.load %arg16[%c0_28, %c0_29] : memref<1x128xf32, #tpu.memory_space<vmem>>, vector<1x128xf32>
    %cst_30 = arith.constant dense<0.000000e+00> : vector<8xf32>
    %74 = vector.multi_reduction <add>, %71, %cst_30 [1] : vector<8x128xf32> to vector<8xf32>
    %75 = vector.shape_cast %74 : vector<8xf32> to vector<8x1xf32>
    %cst_31 = arith.constant 1.280000e+02 : f32
    %76 = vector.broadcast %cst_31 : f32 to vector<8x1xf32>
    %77 = arith.divf %75, %76 : vector<8x1xf32>
    %78 = vector.broadcast %77 : vector<8x1xf32> to vector<8x128xf32>
    %79 = arith.subf %71, %78 : vector<8x128xf32>
    %80 = arith.mulf %79, %79 : vector<8x128xf32>
    %cst_32 = arith.constant dense<0.000000e+00> : vector<8xf32>
    %81 = vector.multi_reduction <add>, %80, %cst_32 [1] : vector<8x128xf32> to vector<8xf32>
    %82 = vector.shape_cast %81 : vector<8xf32> to vector<8x1xf32>
    %cst_33 = arith.constant 1.280000e+02 : f32
    %83 = vector.broadcast %cst_33 : f32 to vector<8x1xf32>
    %84 = arith.divf %82, %83 : vector<8x1xf32>
    %85 = vector.broadcast %77 : vector<8x1xf32> to vector<8x128xf32>
    %86 = arith.subf %71, %85 : vector<8x128xf32>
    %cst_34 = arith.constant 9.99999974E-6 : f32
    %87 = vector.broadcast %cst_34 : f32 to vector<8x1xf32>
    %88 = arith.addf %84, %87 : vector<8x1xf32>
    %89 = math.rsqrt %88 : vector<8x1xf32>
    %90 = vector.broadcast %89 : vector<8x1xf32> to vector<8x128xf32>
    %91 = arith.mulf %86, %90 : vector<8x128xf32>
    %92 = vector.broadcast %72 : vector<1x128xf32> to vector<8x128xf32>
    %93 = arith.mulf %91, %92 : vector<8x128xf32>
    %94 = vector.broadcast %73 : vector<1x128xf32> to vector<8x128xf32>
    %95 = arith.addf %93, %94 : vector<8x128xf32>
    %cst_35 = arith.constant 0.000000e+00 : f32
    %96 = vector.broadcast %cst_35 : f32 to vector<8x128xf32>
    %97 = arith.cmpf oge, %95, %96 : vector<8x128xf32>
    %98 = vector.broadcast %0 : f32 to vector<8x128xf32>
    %99 = arith.mulf %98, %95 : vector<8x128xf32>
    %100 = arith.select %97, %95, %99 : vector<8x128xi1>, vector<8x128xf32>
    %c0_36 = arith.constant 0 : index
    %c0_37 = arith.constant 0 : index
    %101 = vector.load %arg7[%c0_36, %c0_37] : memref<8x128xf32, #tpu.memory_space<vmem>>, vector<8x128xf32>
    %c0_38 = arith.constant 0 : index
    %c0_39 = arith.constant 0 : index
    %102 = vector.load %arg2[%c0_38, %c0_39] : memref<8x1xi32, #tpu.memory_space<vmem>>, vector<8x1xi32>
    %103 = tpu.iota {dimensions = array<i32: 1>} : vector<8x8xi32>
    %104 = vector.broadcast %102 : vector<8x1xi32> to vector<8x8xi32>
    %105 = arith.cmpi eq, %103, %104 : vector<8x8xi32>
    %106 = arith.extui %105 : vector<8x8xi1> to vector<8x8xi32>
    %107 = arith.sitofp %106 : vector<8x8xi32> to vector<8x8xf32>
    %cst_40 = arith.constant dense<0.000000e+00> : vector<8x128xf32>
    %108 = tpu.matmul %107, %101, %cst_40 {dimension_numbers = #tpu.dot_dimension_numbers<[1], [0], [0], [1], [0, 0, 1, 1], [], []>} : vector<8x8xf32>, vector<8x128xf32>, vector<8x128xf32> -> vector<8x128xf32>
    %109 = arith.mulf %108, %100 : vector<8x128xf32>
    %c0_41 = arith.constant 0 : index
    %c0_42 = arith.constant 0 : index
    %110 = vector.load %arg17[%c0_41, %c0_42] : memref<256x128xf32, #tpu.memory_space<vmem>>, vector<128x128xf32>
    %cst_43 = arith.constant dense<0.000000e+00> : vector<8x128xf32>
    %111 = tpu.matmul %55, %110, %cst_43 {dimension_numbers = #tpu.dot_dimension_numbers<[1], [0], [0], [1], [0, 0, 1, 1], [], []>} : vector<8x128xf32>, vector<128x128xf32>, vector<8x128xf32> -> vector<8x128xf32>
    %c128 = arith.constant 128 : index
    %c0_44 = arith.constant 0 : index
    %112 = vector.load %arg17[%c128, %c0_44] : memref<256x128xf32, #tpu.memory_space<vmem>>, vector<128x128xf32>
    %cst_45 = arith.constant dense<0.000000e+00> : vector<8x128xf32>
    %113 = tpu.matmul %109, %112, %cst_45 {dimension_numbers = #tpu.dot_dimension_numbers<[1], [0], [0], [1], [0, 0, 1, 1], [], []>} : vector<8x128xf32>, vector<128x128xf32>, vector<8x128xf32> -> vector<8x128xf32>
    %114 = arith.addf %111, %113 : vector<8x128xf32>
    %c0_46 = arith.constant 0 : index
    %c0_47 = arith.constant 0 : index
    %115 = vector.load %arg18[%c0_46, %c0_47] : memref<1x128xf32, #tpu.memory_space<vmem>>, vector<1x128xf32>
    %116 = vector.broadcast %115 : vector<1x128xf32> to vector<8x128xf32>
    %117 = arith.addf %114, %116 : vector<8x128xf32>
    %c0_48 = arith.constant 0 : index
    %c0_49 = arith.constant 0 : index
    %118 = vector.load %arg19[%c0_48, %c0_49] : memref<1x128xf32, #tpu.memory_space<vmem>>, vector<1x128xf32>
    %c0_50 = arith.constant 0 : index
    %c0_51 = arith.constant 0 : index
    %119 = vector.load %arg20[%c0_50, %c0_51] : memref<1x128xf32, #tpu.memory_space<vmem>>, vector<1x128xf32>
    %cst_52 = arith.constant dense<0.000000e+00> : vector<8xf32>
    %120 = vector.multi_reduction <add>, %117, %cst_52 [1] : vector<8x128xf32> to vector<8xf32>
    %121 = vector.shape_cast %120 : vector<8xf32> to vector<8x1xf32>
    %cst_53 = arith.constant 1.280000e+02 : f32
    %122 = vector.broadcast %cst_53 : f32 to vector<8x1xf32>
    %123 = arith.divf %121, %122 : vector<8x1xf32>
    %124 = vector.broadcast %123 : vector<8x1xf32> to vector<8x128xf32>
    %125 = arith.subf %117, %124 : vector<8x128xf32>
    %126 = arith.mulf %125, %125 : vector<8x128xf32>
    %cst_54 = arith.constant dense<0.000000e+00> : vector<8xf32>
    %127 = vector.multi_reduction <add>, %126, %cst_54 [1] : vector<8x128xf32> to vector<8xf32>
    %128 = vector.shape_cast %127 : vector<8xf32> to vector<8x1xf32>
    %cst_55 = arith.constant 1.280000e+02 : f32
    %129 = vector.broadcast %cst_55 : f32 to vector<8x1xf32>
    %130 = arith.divf %128, %129 : vector<8x1xf32>
    %131 = vector.broadcast %123 : vector<8x1xf32> to vector<8x128xf32>
    %132 = arith.subf %117, %131 : vector<8x128xf32>
    %cst_56 = arith.constant 9.99999974E-6 : f32
    %133 = vector.broadcast %cst_56 : f32 to vector<8x1xf32>
    %134 = arith.addf %130, %133 : vector<8x1xf32>
    %135 = math.rsqrt %134 : vector<8x1xf32>
    %136 = vector.broadcast %135 : vector<8x1xf32> to vector<8x128xf32>
    %137 = arith.mulf %132, %136 : vector<8x128xf32>
    %138 = vector.broadcast %118 : vector<1x128xf32> to vector<8x128xf32>
    %139 = arith.mulf %137, %138 : vector<8x128xf32>
    %140 = vector.broadcast %119 : vector<1x128xf32> to vector<8x128xf32>
    %141 = arith.addf %139, %140 : vector<8x128xf32>
    %cst_57 = arith.constant 0.000000e+00 : f32
    %142 = vector.broadcast %cst_57 : f32 to vector<8x128xf32>
    %143 = arith.cmpf oge, %141, %142 : vector<8x128xf32>
    %144 = vector.broadcast %0 : f32 to vector<8x128xf32>
    %145 = arith.mulf %144, %141 : vector<8x128xf32>
    %146 = arith.select %143, %141, %145 : vector<8x128xi1>, vector<8x128xf32>
    %c0_58 = arith.constant 0 : index
    %c0_59 = arith.constant 0 : index
    %147 = vector.load %arg8[%c0_58, %c0_59] : memref<64x128xf32, #tpu.memory_space<vmem>>, vector<64x128xf32>
    %c0_60 = arith.constant 0 : index
    %c0_61 = arith.constant 0 : index
    %148 = vector.load %arg3[%c0_60, %c0_61] : memref<8x1xi32, #tpu.memory_space<vmem>>, vector<8x1xi32>
    %149 = tpu.iota {dimensions = array<i32: 1>} : vector<8x64xi32>
    %150 = vector.broadcast %148 : vector<8x1xi32> to vector<8x64xi32>
    %151 = arith.cmpi eq, %149, %150 : vector<8x64xi32>
    %152 = arith.extui %151 : vector<8x64xi1> to vector<8x64xi32>
    %153 = arith.sitofp %152 : vector<8x64xi32> to vector<8x64xf32>
    %cst_62 = arith.constant dense<0.000000e+00> : vector<8x128xf32>
    %154 = tpu.matmul %153, %147, %cst_62 {dimension_numbers = #tpu.dot_dimension_numbers<[1], [0], [0], [1], [0, 0, 1, 1], [], []>} : vector<8x64xf32>, vector<64x128xf32>, vector<8x128xf32> -> vector<8x128xf32>
    %155 = arith.negf %154 : vector<8x128xf32>
    %156 = math.exp %155 : vector<8x128xf32>
    %cst_63 = arith.constant 1.000000e+00 : f32
    %157 = vector.broadcast %cst_63 : f32 to vector<8x128xf32>
    %158 = arith.addf %157, %156 : vector<8x128xf32>
    %159 = arith.divf %157, %158 : vector<8x128xf32>
    %160 = arith.mulf %159, %146 : vector<8x128xf32>
    %c0_64 = arith.constant 0 : index
    %c0_65 = arith.constant 0 : index
    %161 = vector.load %arg21[%c0_64, %c0_65] : memref<1x128xf32, #tpu.memory_space<vmem>>, vector<1x128xf32>
    %162 = vector.broadcast %161 : vector<1x128xf32> to vector<8x128xf32>
    %163 = arith.mulf %160, %162 : vector<8x128xf32>
    %cst_66 = arith.constant dense<0.000000e+00> : vector<8xf32>
    %164 = vector.multi_reduction <add>, %163, %cst_66 [1] : vector<8x128xf32> to vector<8xf32>
    %165 = vector.shape_cast %164 : vector<8xf32> to vector<8x1xf32>
    %166 = vector.broadcast %1 : f32 to vector<8x1xf32>
    %167 = arith.addf %165, %166 : vector<8x1xf32>
    %168 = arith.negf %167 : vector<8x1xf32>
    %169 = math.exp %168 : vector<8x1xf32>
    %cst_67 = arith.constant 1.000000e+00 : f32
    %170 = vector.broadcast %cst_67 : f32 to vector<8x1xf32>
    %171 = arith.addf %170, %169 : vector<8x1xf32>
    %172 = arith.divf %170, %171 : vector<8x1xf32>
    %c0_68 = arith.constant 0 : index
    %c0_69 = arith.constant 0 : index
    %173 = vector.load %arg23[%c0_68, %c0_69] : memref<8x1xf32, #tpu.memory_space<vmem>>, vector<8x1xf32>
    tpu.vector_store %arg23[%c0_68, %c0_69], %172 {strides = array<i32>} : memref<8x1xf32, #tpu.memory_space<vmem>>, vector<8x1xf32>,
    return
  }
  func.func @transform_0(%arg0: i32) -> (i32, i32) {
    %c0_i32 = arith.constant 0 : i32
    %c0_i32_0 = arith.constant 0 : i32
    return %arg0, %c0_i32 : i32, i32
  }
  func.func @transform_1(%arg0: i32) -> (i32, i32) {
    %c0_i32 = arith.constant 0 : i32
    %c0_i32_0 = arith.constant 0 : i32
    return %arg0, %c0_i32 : i32, i32
  }
  func.func @transform_2(%arg0: i32) -> (i32, i32) {
    %c0_i32 = arith.constant 0 : i32
    %c0_i32_0 = arith.constant 0 : i32
    return %arg0, %c0_i32 : i32, i32
  }
  func.func @transform_3(%arg0: i32) -> (i32, i32) {
    %c0_i32 = arith.constant 0 : i32
    %c0_i32_0 = arith.constant 0 : i32
    return %arg0, %c0_i32 : i32, i32
  }
  func.func @transform_4(%arg0: i32) -> (i32, i32) {
    %c0_i32 = arith.constant 0 : i32
    %c0_i32_0 = arith.constant 0 : i32
    return %arg0, %c0_i32 : i32, i32
  }
  func.func @transform_5(%arg0: i32) -> (i32, i32) {
    %c0_i32 = arith.constant 0 : i32
    %c0_i32_0 = arith.constant 0 : i32
    %c0_i32_1 = arith.constant 0 : i32
    return %c0_i32, %c0_i32_0 : i32, i32
  }
  func.func @transform_6(%arg0: i32) -> (i32, i32) {
    %c0_i32 = arith.constant 0 : i32
    %c0_i32_0 = arith.constant 0 : i32
    %c0_i32_1 = arith.constant 0 : i32
    return %c0_i32, %c0_i32_0 : i32, i32
  }
  func.func @transform_7(%arg0: i32) -> (i32, i32) {
    %c0_i32 = arith.constant 0 : i32
    %c0_i32_0 = arith.constant 0 : i32
    %c0_i32_1 = arith.constant 0 : i32
    return %c0_i32, %c0_i32_0 : i32, i32
  }
  func.func @transform_8(%arg0: i32) -> (i32, i32) {
    %c0_i32 = arith.constant 0 : i32
    %c0_i32_0 = arith.constant 0 : i32
    %c0_i32_1 = arith.constant 0 : i32
    return %c0_i32, %c0_i32_0 : i32, i32
  }
  func.func @transform_9(%arg0: i32) -> (i32, i32) {
    %c0_i32 = arith.constant 0 : i32
    %c0_i32_0 = arith.constant 0 : i32
    %c0_i32_1 = arith.constant 0 : i32
    return %c0_i32, %c0_i32_0 : i32, i32
  }
  func.func @transform_10(%arg0: i32) -> (i32, i32) {
    %c0_i32 = arith.constant 0 : i32
    %c0_i32_0 = arith.constant 0 : i32
    %c0_i32_1 = arith.constant 0 : i32
    return %c0_i32, %c0_i32_0 : i32, i32
  }
  func.func @transform_11(%arg0: i32) -> (i32, i32) {
    %c0_i32 = arith.constant 0 : i32
    %c0_i32_0 = arith.constant 0 : i32
    %c0_i32_1 = arith.constant 0 : i32
    return %c0_i32, %c0_i32_0 : i32, i32
  }
  func.func @transform_12(%arg0: i32) -> (i32, i32) {
    %c0_i32 = arith.constant 0 : i32
    %c0_i32_0 = arith.constant 0 : i32
    %c0_i32_1 = arith.constant 0 : i32
    return %c0_i32, %c0_i32_0 : i32, i32
  }
  func.func @transform_13(%arg0: i32) -> (i32, i32) {
    %c0_i32 = arith.constant 0 : i32
    %c0_i32_0 = arith.constant 0 : i32
    %c0_i32_1 = arith.constant 0 : i32
    return %c0_i32, %c0_i32_0 : i32, i32
  }
  func.func @transform_14(%arg0: i32) -> (i32, i32) {
    %c0_i32 = arith.constant 0 : i32
    %c0_i32_0 = arith.constant 0 : i32
    %c0_i32_1 = arith.constant 0 : i32
    return %c0_i32, %c0_i32_0 : i32, i32
  }
  func.func @transform_15(%arg0: i32) -> (i32, i32) {
    %c0_i32 = arith.constant 0 : i32
    %c0_i32_0 = arith.constant 0 : i32
    %c0_i32_1 = arith.constant 0 : i32
    return %c0_i32, %c0_i32_0 : i32, i32
  }
  func.func @transform_16(%arg0: i32) -> (i32, i32) {
    %c0_i32 = arith.constant 0 : i32
    %c0_i32_0 = arith.constant 0 : i32
    %c0_i32_1 = arith.constant 0 : i32
    return %c0_i32, %c0_i32_0 : i32, i32
  }
  func.func @transform_17(%arg0: i32) -> (i32, i32) {
    %c0_i32 = arith.constant 0 : i32
    %c0_i32_0 = arith.constant 0 : i32
    %c0_i32_1 = arith.constant 0 : i32
    return %c0_i32, %c0_i32_0 : i32, i32
  }
  func.func @transform_18(%arg0: i32) -> (i32, i32) {
    %c0_i32 = arith.constant 0 : i32
    %c0_i32_0 = arith.constant 0 : i32
    %c0_i32_1 = arith.constant 0 : i32
    return %c0_i32, %c0_i32_0 : i32, i32
  }
  func.func @transform_19(%arg0: i32) -> (i32, i32) {
    %c0_i32 = arith.constant 0 : i32
    %c0_i32_0 = arith.constant 0 : i32
    %c0_i32_1 = arith.constant 0 : i32
    return %c0_i32, %c0_i32_0 : i32, i32
  }
  func.func @transform_20(%arg0: i32) -> (i32, i32) {
    %c0_i32 = arith.constant 0 : i32
    %c0_i32_0 = arith.constant 0 : i32
    %c0_i32_1 = arith.constant 0 : i32
    return %c0_i32, %c0_i32_0 : i32, i32
  }
  func.func @transform_21(%arg0: i32) -> i32 {
    %c0_i32 = arith.constant 0 : i32
    %c0_i32_0 = arith.constant 0 : i32
    return %c0_i32 : i32
  }
  func.func @transform_22(%arg0: i32) -> (i32, i32) {
    %c0_i32 = arith.constant 0 : i32
    %c0_i32_0 = arith.constant 0 : i32
    return %arg0, %c0_i32 : i32, i32
  }
}

</mosaic_0001>

<bundles_post_ra>
// kernel: tpu_custom_call.1
= control target key start
LH: loop header
LB: loop body
LE: loop exit
PB: predicated region body
PF: predicated region fallthrough
CT: control target
= control target key end

     0   :  { %s2230_s0 = inlined_call_operand.vmem [shape: s32[16,1], index: 0, kind: input, shape index: {}]   ;;  %s2231_s1 = inlined_call_operand.vmem [shape: s32[16,1], index: 1, kind: input, shape index: {}]   ;;  %s2232_s2 = inlined_call_operand.vmem [shape: s32[16,1], index: 2, kind: input, shape index: {}]   ;;  %s2233_s3 = inlined_call_operand.vmem [shape: f32[16,2], index: 3, kind: input, shape index: {}]   ;;  %s2234_s4 = inlined_call_operand.vmem [shape: f32[16,2], index: 4, kind: input, shape index: {}]   ;;  %s2235_s5 = inlined_call_operand.vmem [shape: f32[16,128], index: 5, kind: input, shape index: {}]   ;;  %s2236_s6 = inlined_call_operand.vmem [shape: f32[8,128], index: 6, kind: input, shape index: {}]   ;;  %s2237_s7 = inlined_call_operand.vmem [shape: f32[64,128], index: 7, kind: input, shape index: {}]   ;;  %s2238_s8 = inlined_call_operand.vmem [shape: f32[2,128], index: 8, kind: input, shape index: {}]   ;;  %s2239_s9 = inlined_call_operand.vmem [shape: f32[1,128], index: 9, kind: input, shape index: {}]   ;;  %s2240_s10 = inlined_call_operand.vmem [shape: f32[1,128], index: 10, kind: input, shape index: {}]   ;;  %s2241_s11 = inlined_call_operand.vmem [shape: f32[1,128], index: 11, kind: input, shape index: {}]   ;;  %s2242_s12 = inlined_call_operand.vmem [shape: f32[2,128], index: 12, kind: input, shape index: {}]   ;;  %s2243_s13 = inlined_call_operand.vmem [shape: f32[1,128], index: 13, kind: input, shape index: {}]   ;;  %s2244_s14 = inlined_call_operand.vmem [shape: f32[1,128], index: 14, kind: input, shape index: {}]   ;;  %s2245_s15 = inlined_call_operand.vmem [shape: f32[1,128], index: 15, kind: input, shape index: {}]   ;;  %s2246_s16 = inlined_call_operand.hbm [shape: f32[256,128], index: 16, kind: input, shape index: {}]   ;;  %s2247_s17 = inlined_call_operand.vmem [shape: f32[1,128], index: 17, kind: input, shape index: {}]   ;;  %s2248_s18 = inlined_call_operand.vmem [shape: f32[1,128], index: 18, kind: input, shape index: {}]   ;;  %s2249_s19 = inlined_call_operand.vmem [shape: f32[1,128], index: 19, kind: input, shape index: {}]   ;;  %s2250_s20 = inlined_call_operand.vmem [shape: f32[1,128], index: 20, kind: input, shape index: {}]   ;;  %s2251_s21 = inlined_call_operand.vmem [shape: f32[2], index: 21, kind: input, shape index: {}]   ;;  %s2252_s22 = inlined_call_operand.vmem [shape: f32[16,1], index: 22, kind: output, shape index: {}]  }
   0x1   :  { %2257 = sst [smem:[#allocation8_spill]] %s2230_s0 }
   0x2   :  { %2258 = sst [smem:[#allocation9_spill]] %s2231_s1 }
   0x3   :  { %2259 = sst [smem:[#allocation10_spill]] %s2232_s2 }
   0x4   :  { %2260 = sst [smem:[#allocation11_spill]] %s2233_s3 }
   0x5   :  { %2261 = sst [smem:[#allocation12_spill]] %s2234_s4 }
   0x6   :  { %2262 = sst [smem:[#allocation13_spill]] %s2235_s5 }
   0x7   :  { %2263 = sst [smem:[#allocation14_spill]] %s2236_s6 }
   0x8   :  { %27 = vsyncpa [#allocation3], 0 }
   0x9   :  { %28 = vsyncpa [#allocation4], 0  ;;  %s2005_s3 = smov 0  }
   0xa LB: > { %s2011_s28 = sadd.s32 4294967295, %s1879_s3   ;;  %p1522_p0 = scmp.ge.s32.totalorder %s1879_s3, 1  ;;  %s1879_s3 = sphi %s2005_s3, %s34_s3  }
   0xb   : > { %p552_p1 = scmp.lt.s32.totalorder %s1879_s3, 3  ;;  %s1881_s29 = smov [#allocation2]  }
   0xc   : > { %s597_s30 = sshll.u32 %s1881_s29, 4  ;;  %p2254_p3 = scmp.eq.s32.totalorder %s2011_s28, 0  ;;  %s598_s30 = int_to_ptr.vmem [resolvable:$true] %s597_s30 }
   0xd   : > { %p2015_p2 = pnand %p1522_p0, %p552_p1  ;;  %s623_s1 = sshll.u32 %s2251_s21, 4  ;;  %s2031_s1 = int_to_ptr.vmem [resolvable:$true] %s623_s1 }
   0xe   : > { %s1822_s25 = scalar_lea.hbm %s2246_s16, 4096 }
   0xf   : > { %s2264_s4 = scalar_select %p2015_p2, 1, 0 }
  0x10   : > { %p1776_p4 = pneg %p2015_p2  ;;  %p1823_p6 = scmp.ne.s32.totalorder %s2246_s16, %s1822_s25 }
  0x11   : > { %p1829_p10 = scmp.lt.u32.totalorder %s1822_s25, %s2246_s16 }
  0x12   : > { %p2027_p5 = pnand %p2254_p3, %p1776_p4 }
  0x14   : > { %p1824_p7 = pneg %p2027_p5 }
  0x16   : > { %p1825_p8 = pnand %p1824_p7, %p1823_p6 }
  0x18   : > { %p1826_p9 = pneg %p1825_p8 }
  0x1a   : > { %p1831_p11 = pnand %p1829_p10, %p1826_p9 }
  0x1c   : > { %1834 = shalt.err (!%p1831_p11)
}
  0x1d   : > { %s1835_s0 = scalar_lea.vmem %s598_s30, 4096  ;;  %p1843_p1 = scmp.lt.s32.totalorder %s598_s30, %s598_s30 }
  0x1e   : > { %p1836_p12 = scmp.ne.s32.totalorder %s598_s30, %s1835_s0  ;;  %p1844_p4 = scmp.lt.s32.totalorder %s1835_s0, %s1835_s0 }
  0x20   : > { %p1838_p13 = pnand %p1836_p12, %p1824_p7  ;;  %p1845_p3 = por %p1844_p4, %p1843_p1 }
  0x22   : > { %p1839_p0 = pneg %p1838_p13 }
  0x24   : > { %p1846_p2 = pnand %p1845_p3, %p1839_p0 }
  0x26   : > { %1849 = shalt.err (!%p1846_p2)
}
  0x27   : > { %s1882_s23 = smov 128   ;;  %s1883_s24 = smov 8  }
  0x28   : > { %1779 = dma.hbm_to_vmem [thread:$0]  (!%p2027_p5), %s2246_s16, 4096, %s598_s30, [#allocation3], %s1882_s23, %s1882_s23, %s1883_s24  }
  0x29   : > { %s1850_s26 = scalar_lea.vmem %s2031_s1, 16  ;;  %p1858_p2 = scmp.lt.s32.totalorder %s2031_s1, %s2031_s1 }
  0x2a   : > { %p1851_p6 = scmp.ne.s32.totalorder %s2031_s1, %s1850_s26  ;;  %p1859_p3 = scmp.lt.s32.totalorder %s1850_s26, %s1850_s26 }
  0x2c   : > { %p1853_p8 = pnand %p1851_p6, %p1824_p7  ;;  %p1860_p10 = por %p1859_p3, %p1858_p2 }
  0x2e   : > { %p1854_p9 = pneg %p1853_p8 }
  0x30   : > { %p1861_p11 = pnand %p1860_p10, %p1854_p9 }
  0x32   : > { %1864 = shalt.err (!%p1861_p11)
}
  0x33   : > { %s1884_s2 = smov [#allocation5]   ;;  %p2266_p12 = scmp.ne.s32.totalorder %s2264_s4, 0 }
  0x34   : > { %1782 = dma.vmem_to_smem (!%p2027_p5), %s2031_s1, 16, %s1884_s2, [#allocation4]  }
  0x35   : > { %671 = sbr.rel (%p2266_p12) target bundleno = 1241 (0x4d9), region = 108  ;;  %p2267_p13 = scmp.eq.s32.totalorder (!%p2266_p12), %s2011_s28, 0 }
  0x3c   : > { %1870 = dma.done.wait (%p2267_p13), [#allocation3], 4096   ;;  %p2268_p7 = pmov %p2267_p13 }
  0x3e   : > { %1872 = vsyncadd (%p2268_p7), [#allocation3], 4294963200  ;;  %p2269_p0 = pmov %p2268_p7 }
  0x40   : > { %1874 = dma.done.wait (%p2269_p0), [#allocation4], 16   ;;  %p2270_p1 = pmov %p2269_p0 }
  0x42   : > { %1876 = vsyncadd (%p2270_p1), [#allocation4], 4294967280 }
  0x43   : > { %681 = sfence }
  0x44   : > { %p752_p4 = scmp.lt.s32.totalorder %s2011_s28, 1  ;;  %s2271_s4 = sld [smem:[#allocation13_spill]]  ;;  %v1885_v2 = vmov 0   ;;  %v1886_v4 = vmov 0.0|0.0   ;;  %v1887_v7 = vmov 0.0   ;;  %vm1888_vm0 = vmmov 0  }
  0x45   : > { %1805 = vset.pattern.permute.xlu1 %v1885_v2  ;;  %1804 = vset.pattern.permute.xlu0 %v1885_v2  ;;  %s2272_s24 = sld [smem:[#allocation11_spill]]  ;;  %s2273_s2 = sld [smem:[#allocation8_spill]]  ;;  %v1889_v9 = vmov 1   ;;  %v786_v11 = vlaneseq  ;;  %v779_v16 = vld [vmem:[%s2238_s8] sm:$0x3]  ;;  %vm851_vm1 = vcmask 130048  }
  0x46   : > { %s2279_s28 = smov (!%p752_p4, %s2011_s28), 1  ;;  %1705 = vmatprep.subr.bf16.mxu0 %v1886_v4  ;;  %1708 = vmatprep.subr.bf16.mxu1 %v1886_v4  ;;  %s2274_s27 = sld [smem:[#allocation9_spill]]  ;;  %v927_v22 = vld [vmem:[%s2242_s12] sm:$0x3]  ;;  %vm994_vm3 = vcmask 64512   ;;  %v1070_v42 = vld [vmem:[#allocation2 + $0x8] sm:$0xff] }
  0x47   : > { %s2085_s29 = sshll.u32 %s2279_s28, 3  ;;  %1608 = vmatprep.mubr.msk.f32.mxu0 %vm1888_vm0, %v1887_v7  ;;  %1648 = vmatprep.mubr.msk.f32.mxu1 %vm1888_vm0, %v1887_v7  ;;  %s2275_s23 = sld [smem:[#allocation12_spill]]  ;;  %v787_v12 = vshrl.u32 %v786_v11, 7  ;;  %v2108_v14 = vand.u32 127, %v786_v11  ;;  %v1536_v31 = vld [vmem:[%s2239_s9] ss:$0 sm:$0xff] }
  0x48   : > { %v1541_v38 = vld [vmem:[%s2243_s13] ss:$0 sm:$0xff]  ;;  %v1086_v45 = vld [vmem:[#allocation2 + $0x88] sm:$0xff]  ;;  %v1071_v46 = vld [vmem:[#allocation2 + $0x10] sm:$0xff]  ;;  %s776_s25 = sld [smem:[#allocation5]]  ;;  %vm1294_vm8 = vcmask 523264  }
  0x49   : > { %v788_v13 = vsub.s32 0, %v787_v12  ;;  %v797_v15 = vsub.s32 1, %v787_v12  ;;  %v1069_v41 = vld [vmem:[#allocation2] sm:$0xff]  ;;  %v1072_v47 = vld [vmem:[#allocation2 + $0x18] sm:$0xff]  ;;  %v1087_v58 = vld [vmem:[#allocation2 + $0x90] sm:$0xff]  ;;  %s1535_s28 = sld [smem:[#allocation5 + $0x1]] }
  0x4a   : > { %v840_v0 = vld [vmem:[%s2271_s4] sm:$0xff]  ;;  %v841_v1 = vld [vmem:[%s2271_s4 + $0x8] sm:$0xff]  ;;  %v1733_v44 = vpack.c.bf16 %v1070_v42, %v1069_v41  ;;  %v1736_v49 = vpack.c.bf16 %v1072_v47, %v1071_v46  ;;  %v1088_v59 = vld [vmem:[#allocation2 + $0x98] sm:$0xff]  ;;  %vm1393_vm10 = vcmask 7168  }
  0x4b   : > { %v1706_v3 = vpack.c.bf16 %v841_v1, %v840_v0  ;;  %s767_s6 = scalar_lea.vmem %s2272_s24, %s2085_s29  ;;  %s755_s30 = scalar_lea.vmem %s2273_s2, %s2085_s29  ;;  %v789_v19 = vrot.slane %v779_v16, %v788_v13  ;;  %v798_v20 = vrot.slane %v779_v16, %v797_v15  ;;  %v937_v26 = vrot.slane %v927_v22, %v788_v13  ;;  %v1085_v43 = vld [vmem:[#allocation2 + $0x80] sm:$0xff]  ;;  %v1074_v62 = vld [vmem:[#allocation2 + $0x28] sm:$0xff] }
  0x4c   : > { %v778_v5 = vld [vmem:[%s767_s6] sm:$0xff]  ;;  %s759_s4 = scalar_lea.vmem %s2274_s27, %s2085_s29  ;;  %s2276_s2 = sld [smem:[#allocation14_spill]]  ;;  %v946_v29 = vrot.slane %v927_v22, %v797_v15  ;;  %v1709_v48 = vpack.c.bf16 %v1086_v45, %v1085_v43  ;;  %v1712_v61 = vpack.c.bf16 %v1088_v59, %v1087_v58  ;;  %v1090_v1 = vld [vmem:[#allocation2 + $0xa8] sm:$0xff]  ;;  %v1096_v22 = vld [vmem:[#allocation2 + $0xd8] sm:$0xff] }
  0x4d   : > { %1707 = vmatpush3.bf16.msra.mxu0 %v1706_v3  ;;  %783 = vperm.xlu1 %1805, %v778_v5   ;;  %v842_v6 = vld [vmem:[%s755_s30] sm:$0xff]  ;;  %s771_s24 = scalar_lea.vmem %s2275_s23, %s2085_s29  ;;  %v1078_v12 = vld [vmem:[#allocation2 + $0x48] sm:$0xff] }
  0x4e   : > { %846 = vperm.xlu0 %1804, %v842_v6   ;;  %1611 = vmatprep.subr.mxu0 %v1887_v7  ;;  %v987_v8 = vld [vmem:[%s759_s4] sm:$0xff]  ;;  %v1094_v16 = vld [vmem:[#allocation2 + $0xc8] sm:$0xff]  ;;  %s2277_s4 = sld [smem:[#allocation10_spill]] }
  0x4f   : > { %v926_v10 = vld [vmem:[%s771_s24] sm:$0xff]  ;;  %1710 = vmatpush3.bf16.msra.mxu1 %v1709_v48  ;;  %s775_s24 = scalar_lea.vmem %s2252_s22, %s2085_s29 }
  0x50   : > { %1711 = vmatprep.subr.bf16.mxu1 %v1886_v4  ;;  %v1073_v60 = vld [vmem:[#allocation2 + $0x20] sm:$0xff] }
  0x51   : > { %1806 = vset.pattern.permute.xlu1 %v1889_v9  ;;  %v1739_v63 = vpack.c.bf16 %v1074_v62, %v1073_v60  ;;  %v1089_v0 = vld [vmem:[#allocation2 + $0xa0] sm:$0xff]  ;;  %v1092_v9 = vld [vmem:[#allocation2 + $0xb8] sm:$0xff] }
  0x52   : > { %989 = vperm.xlu0 %1804, %v987_v8   ;;  %792 = vperm.xlu1 %1806, %v778_v5   ;;  %v986_v21 = vld [vmem:[%s2276_s2] sm:$0xff]  ;;  %v1715_v3 = vpack.c.bf16 %v1090_v1, %v1089_v0  ;;  %v1076_v5 = vld [vmem:[#allocation2 + $0x38] sm:$0xff]  ;;  %v1091_v8 = vld [vmem:[#allocation2 + $0xb0] sm:$0xff] }
  0x53   : > { %1713 = vmatpush3.bf16.msra.mxu1 %v1712_v61  ;;  %v1718_v11 = vpack.c.bf16 %v1092_v9, %v1091_v8  ;;  %v1093_v15 = vld [vmem:[#allocation2 + $0xc0] sm:$0xff]  ;;  %v1282_v8 = vld [vmem:[%s2237_s7 + $0x18] sm:$0xff] }
  0x54   : > { %1714 = vmatprep.subr.bf16.mxu1 %v1886_v4  ;;  %s763_s6 = scalar_lea.vmem %s2277_s4, %s2085_s29  ;;  %v1537_v48 = vld [vmem:[%s2240_s10] ss:$0 sm:$0xff] }
  0x55   : > { %v1543_v59 = vld [vmem:[%s2245_s15] ss:$0 sm:$0xff] }
  0x56   : > { %931 = vperm.xlu0 %1804, %v926_v10   ;;  %940 = vperm.xlu1 %1806, %v926_v10   ;;  %v1077_v10 = vld [vmem:[#allocation2 + $0x40] sm:$0xff] }
  0x57   : > { %1716 = vmatpush3.bf16.msra.mxu1 %v1715_v3  ;;  %v1745_v13 = vpack.c.bf16 %v1078_v12, %v1077_v10  ;;  %v1280_v3 = vld [vmem:[%s2237_s7 + $0x8] sm:$0xff]  ;;  %v1283_v10 = vld [vmem:[%s2237_s7 + $0x20] sm:$0xff] }
  0x58   : > { %1717 = vmatprep.subr.bf16.mxu1 %v1886_v4 }
  0x5a   : > { %1807 = vset.pattern.permute.xlu1 %v1885_v2  ;;  %v1075_v2 = vld [vmem:[#allocation2 + $0x30] sm:$0xff] }
  0x5b   : > { %v1742_v6 = vpack.c.bf16 %v1076_v5, %v1075_v2  ;;  %1719 = vmatpush3.bf16.msra.mxu1 %v1718_v11  ;;  %v1281_v5 = vld [vmem:[%s2237_s7 + $0x10] sm:$0xff]  ;;  %v1284_v11 = vld [vmem:[%s2237_s7 + $0x28] sm:$0xff] }
  0x5c   : > { %1720 = vmatprep.subr.bf16.mxu1 %v1886_v4  ;;  %v1760_v9 = vpack.c.bf16 %v1282_v8, %v1281_v5  ;;  %v1763_v12 = vpack.c.bf16 %v1284_v11, %v1283_v10 }
  0xcc   : > { %v784_v17 = vpop.permute.xlu1 %783 }
  0xcd   : > { %v847_v18 = vpop.permute.xlu0 %846  ;;  %v790_v27 = vmul.f32 %v789_v19, %v784_v17  ;;  %v1079_v17 = vld [vmem:[#allocation2 + $0x50] sm:$0xff]  ;;  %v1080_v19 = vld [vmem:[#allocation2 + $0x58] sm:$0xff] }
  0xce   : > { %vm848_vm2 = vcmp.eq.s32.totalorder %v2108_v14, %v847_v18  ;;  %v1721_v18 = vpack.c.bf16 %v1094_v16, %v1093_v15  ;;  %v1286_v15 = vld [vmem:[%s2237_s7 + $0x38] sm:$0xff] }
  0xcf   : > { %v1539_v23 = vsel %vm848_vm2, 1.0, %v1887_v7 }
  0xd0   : > { %1609 = vmatmul.mubr.msk.f32.vlgmr.msra.gmra.mrb[0].mxu0 %vm851_vm1, %v1539_v23  ;;  %1722 = vmatpush3.bf16.msra.mxu1 %v1721_v18  ;;  %v1081_v23 = vld [vmem:[#allocation2 + $0x60] sm:$0xff] }
  0xd1   : > { %v990_v24 = vpop.permute.xlu0 %989  ;;  %v793_v25 = vpop.permute.xlu1 %792  ;;  %1612 = vmatpush3.msra.mxu0 %v986_v21  ;;  %1613 = vmatprep.mubr.msk.f32.mxu0 %vm1888_vm0, %v1887_v7  ;;  %v1095_v21 = vld [vmem:[#allocation2 + $0xd0] sm:$0xff] }
  0xd2   : > { %vm991_vm4 = vcmp.eq.s32.totalorder %v2108_v14, %v990_v24  ;;  %v799_v28 = vmul.f32 %v798_v20, %v793_v25  ;;  %1732 = vmatprep.subr.bf16.mxu0 %v1886_v4  ;;  %v1748_v20 = vpack.c.bf16 %v1080_v19, %v1079_v17  ;;  %1723 = vmatprep.subr.bf16.mxu1 %v1886_v4  ;;  %v1082_v25 = vld [vmem:[#allocation2 + $0x68] sm:$0xff] }
  0xd3   : > { %v1544_v30 = vsel %vm991_vm4, 1.0, %v1887_v7  ;;  %v1724_v24 = vpack.c.bf16 %v1096_v22, %v1095_v21  ;;  %v1546_v22 = vld [vmem:[%s2247_s17] ss:$0 sm:$0xff] }
  0xd4   : > { %v800_v32 = vadd.f32 %v799_v28, %v790_v27  ;;  %1614 = vmatmul.mubr.msk.f32.vlgmr.msra.gmra.mrb[2].mxu0 %vm994_vm3, %v1544_v30  ;;  %v1097_v27 = vld [vmem:[#allocation2 + $0xe0] sm:$0xff]  ;;  %v1098_v28 = vld [vmem:[#allocation2 + $0xe8] sm:$0xff] }
  0xd5   : > { %v932_v33 = vpop.permute.xlu0 %931  ;;  %v941_v34 = vpop.permute.xlu1 %940  ;;  %1683 = vmatprep.mubr.msk.f32.mxu0 %vm1888_vm0, %v1887_v7  ;;  %1734 = vmatpush3.bf16.msra.mxu0 %v1733_v44  ;;  %v1727_v30 = vpack.c.bf16 %v1098_v28, %v1097_v27 }
  0xd6   : > { %v938_v35 = vmul.f32 %v937_v26, %v932_v33  ;;  %v947_v36 = vmul.f32 %v946_v29, %v941_v34  ;;  %v807_v37 = vadd.f32 %v1536_v31, %v800_v32  ;;  %1735 = vmatprep.subr.bf16.mxu0 %v1886_v4  ;;  %v1751_v26 = vpack.c.bf16 %v1082_v25, %v1081_v23  ;;  %v1083_v29 = vld [vmem:[#allocation2 + $0x70] sm:$0xff]  ;;  %v1084_v31 = vld [vmem:[#allocation2 + $0x78] sm:$0xff] }
  0xd7   : > { %1725 = vmatpush3.bf16.msra.mxu1 %v1724_v24  ;;  %v1754_v32 = vpack.c.bf16 %v1084_v31, %v1083_v29  ;;  %v1099_v33 = vld [vmem:[#allocation2 + $0xf0] sm:$0xff]  ;;  %v1100_v34 = vld [vmem:[#allocation2 + $0xf8] sm:$0xff] }
  0xd8   : > { %v948_v39 = vadd.f32 %v947_v36, %v938_v35  ;;  %810 = vadd.xlane.f32.xlu0 %v807_v37  ;;  %1726 = vmatprep.subr.bf16.mxu1 %v1886_v4  ;;  %v1730_v35 = vpack.c.bf16 %v1100_v34, %v1099_v33  ;;  %v1287_v36 = vld [vmem:[%s763_s6] sm:$0xff] }
  0xd9   : > { %1737 = vmatpush3.bf16.msra.mxu0 %v1736_v49 }
  0xda   : > { %v955_v40 = vadd.f32 %v1541_v38, %v948_v39  ;;  %1738 = vmatprep.subr.bf16.mxu0 %v1886_v4 }
  0xdb   : > { %1728 = vmatpush3.bf16.msra.mxu1 %v1727_v30 }
  0xdc   : > { %958 = vadd.xlane.f32.xlu1 %v955_v40  ;;  %1729 = vmatprep.subr.bf16.mxu1 %v1886_v4 }
  0xdd   : > { %1740 = vmatpush3.bf16.msra.mxu0 %v1739_v63 }
  0xde   : > { %1741 = vmatprep.subr.bf16.mxu0 %v1886_v4 }
  0xdf   : > { %1731 = vmatpush3.bf16.msra.mxu1 %v1730_v35 }
  0xe0   : > { %1756 = vmatprep.subr.bf16.mxu1 %v1886_v4 }
  0xe1   : > { %1743 = vmatpush3.bf16.msra.mxu0 %v1742_v6 }
  0xe2   : > { %1744 = vmatprep.subr.bf16.mxu0 %v1886_v4 }
  0xe5   : > { %1746 = vmatpush3.bf16.msra.mxu0 %v1745_v13  ;;  %v1285_v13 = vld [vmem:[%s2237_s7 + $0x30] sm:$0xff] }
  0xe6   : > { %1747 = vmatprep.subr.bf16.mxu0 %v1886_v4  ;;  %v1766_v17 = vpack.c.bf16 %v1286_v15, %v1285_v13 }
  0xe9   : > { %1749 = vmatpush3.bf16.msra.mxu0 %v1748_v20 }
  0xea   : > { %1750 = vmatprep.subr.bf16.mxu0 %v1886_v4 }
  0xed   : > { %1752 = vmatpush3.bf16.msra.mxu0 %v1751_v26  ;;  %1289 = vperm.xlu1 %1807, %v1287_v36   ;;  %v1547_v36 = vld [vmem:[%s2248_s18] ss:$0 sm:$0xff] }
  0xee   : > { %1753 = vmatprep.subr.bf16.mxu0 %v1886_v4 }
  0xf1   : > { %1755 = vmatpush3.bf16.msra.mxu0 %v1754_v32 }
 0x165   : > { %v811_v50 = vpop.xlane.xlu0 %810 }
 0x166   : > { %v813_v51 = vmul.f32 0.0078125, %v811_v50  ;;  %v1538_v50 = vld [vmem:[%s2241_s11] ss:$0 sm:$0xff] }
 0x168   : > { %v2137_v52 = vsub.f32 %v807_v37, %v813_v51 }
 0x169   : > { %v959_v53 = vpop.xlane.xlu1 %958 }
 0x16a   : > { %v960_v54 = vmul.f32 0.0078125, %v959_v53  ;;  %v815_v55 = vmul.f32 %v2137_v52, %v2137_v52 }
 0x16c   : > { %v2141_v56 = vsub.f32 %v955_v40, %v960_v54  ;;  %816 = vadd.xlane.f32.xlu0 %v815_v55  ;;  %v2168_v54 = vstv %s776_s25  ;;  %v1542_v55 = vld [vmem:[%s2244_s14] ss:$0 sm:$0xff] }
 0x16d   : > { %v1290_v16 = vpop.permute.xlu1 %1289 }
 0x16e   : > { %v962_v57 = vmul.f32 %v2141_v56, %v2141_v56  ;;  %vm1291_vm7 = vcmp.eq.s32.totalorder %v2108_v14, %v1290_v16 }
 0x16f   : > { %v1549_v18 = vsel %vm1291_vm7, 1.0, %v1887_v7 }
 0x170   : > { %963 = vadd.xlane.f32.xlu0 %v962_v57 }
 0x1a3   : > { %v921_v37 = vpop.f32.mrb[0].mxu0 }
 0x1a4   : > { %v1610_v38 = vpop.f32.mrb[1].mxu0 }
 0x1a5   : > { %v1548_v38 = vld [vmem:[%s2249_s19] ss:$0 sm:$0xff] }
 0x1a7   : > { %v1064_v39 = vpop.f32.mrb[2].mxu0 }
 0x1a8   : > { %v1615_v40 = vpop.f32.mrb[3].mxu0 }
 0x1f9   : > { %v817_v41 = vpop.xlane.xlu0 %816 }
 0x1fa   : > { %v818_v42 = vmul.f32 0.0078125, %v817_v41 }
 0x1fc   : > { %v819_v43 = vadd.f32 1e-05, %v818_v42 }
 0x1fd   : > { %v964_v44 = vpop.xlane.xlu0 %963 }
 0x1fe   : > { %1808 = vrsqrt.f32 %v819_v43  ;;  %v965_v45 = vmul.f32 0.0078125, %v964_v44  ;;  %v1552_v44 = vld [vmem:[%s2250_s20] ss:$0 sm:$0xff] }
 0x200   : > { %v966_v46 = vadd.f32 1e-05, %v965_v45 }
 0x202   : > { %1810 = vrsqrt.f32 %v966_v46 }
 0x208   : > { %v1809_v47 = vpop.eup %1808 }
 0x209   : > { %v821_v49 = vmul.f32 %v1809_v47, %v2137_v52  ;;  %v1385_v47 = vstv %s1535_s28 }
 0x20b   : > { %v828_v51 = vmul.f32 %v1537_v48, %v821_v49 }
 0x20c   : > { %v1811_v53 = vpop.eup %1810 }
 0x20d   : > { %v968_v57 = vmul.f32 %v1811_v53, %v2141_v56  ;;  %v835_v58 = vadd.f32 %v1538_v50, %v828_v51  ;;  %v1279_v56 = vld [vmem:[%s2237_s7] sm:$0xff] }
 0x20e   : > { %v1757_v6 = vpack.c.bf16 %v1280_v3, %v1279_v56 }
 0x20f   : > { %vm836_vm5 = vcmp.ge.f32.partialorder %v835_v58, 0.0  ;;  %v838_v52 = vmul.f32 %v2168_v54, %v835_v58  ;;  %v975_v60 = vmul.f32 %v1542_v55, %v968_v57 }
 0x211   : > { %v839_v61 = vsel %vm836_vm5, %v835_v58, %v838_v52  ;;  %v982_v62 = vadd.f32 %v1543_v59, %v975_v60 }
 0x212   : > { %v925_v63 = vmul.f32 %v921_v37, %v839_v61 }
 0x213   : > { %vm983_vm6 = vcmp.ge.f32.partialorder %v982_v62, 0.0  ;;  %v984_v0 = vmul.f32 %v982_v62, %v2168_v54 }
 0x214   : > { %1684 = vmatmul.mubr.f32.vlgmr.msra.gmra.mrb[4].mxu0 %v925_v63 }
 0x215   : > { %v985_v1 = vsel %vm983_vm6, %v982_v62, %v984_v0 }
 0x216   : > { %v1068_v2 = vmul.f32 %v1064_v39, %v985_v1 }
 0x218   : > { %1649 = vmatmul.mubr.f32.vlgmr.msra.gmra.mrb[0].mxu1 %v1068_v2 }
 0x219   : > { %1702 = vmatprep.mubr.msk.f32.mxu1 %vm1888_vm0, %v1887_v7  ;;  %1758 = vmatpush3.bf16.msra.mxu1 %v1757_v6 }
 0x21a   : > { %1759 = vmatprep.subr.bf16.mxu1 %v1886_v4 }
 0x21d   : > { %1761 = vmatpush3.bf16.msra.mxu1 %v1760_v9 }
 0x21e   : > { %1762 = vmatprep.subr.bf16.mxu1 %v1886_v4 }
 0x221   : > { %1764 = vmatpush3.bf16.msra.mxu1 %v1763_v12 }
 0x222   : > { %1765 = vmatprep.subr.bf16.mxu1 %v1886_v4 }
 0x225   : > { %1767 = vmatpush3.bf16.msra.mxu1 %v1766_v17 }
 0x228   : > { %1703 = vmatmul.mubr.msk.f32.vlgmr.msra.gmra.mrb[2].mxu1 %vm1294_vm8, %v1549_v18 }
 0x2e7   : > { %v1237_v19 = vpop.f32.mrb[4].mxu0 }
 0x2e8   : > { %v1685_v20 = vpop.f32.mrb[5].mxu0 }
 0x2eb   : > { %v1167_v21 = vpop.f32.mrb[0].mxu1 }
 0x2ec   : > { %v1238_v23 = vadd.f32 %v1237_v19, %v1167_v21  ;;  %v1650_v24 = vpop.f32.mrb[1].mxu1 }
 0x2ee   : > { %v1248_v25 = vadd.f32 %v1546_v22, %v1238_v23 }
 0x2f0   : > { %1251 = vadd.xlane.f32.xlu0 %v1248_v25 }
 0x2fb   : > { %v1364_v26 = vpop.f32.mrb[2].mxu1 }
 0x2fc   : > { %v1704_v4 = vpop.f32.mrb[3].mxu1  ;;  %v1551_v29 = vmul.f32 -1.442695, %v1364_v26 }
 0x2fe   : > { %1812 = vpow2.f32 %v1551_v29 }
 0x308   : > { %v1813_v33 = vpop.eup %1812 }
 0x309   : > { %v1371_v34 = vadd.f32 1.0, %v1813_v33 }
 0x37d   : > { %v1252_v27 = vpop.xlane.xlu0 %1251 }
 0x37e   : > { %v1253_v14 = vmul.f32 0.0078125, %v1252_v27 }
 0x380   : > { %v1254_v28 = vsub.f32 %v1248_v25, %v1253_v14 }
 0x382   : > { %v1255_v7 = vmul.f32 %v1254_v28, %v1254_v28 }
 0x384   : > { %1256 = vadd.xlane.f32.xlu0 %v1255_v7 }
 0x411   : > { %v1257_v30 = vpop.xlane.xlu0 %1256 }
 0x412   : > { %v1258_v31 = vmul.f32 0.0078125, %v1257_v30 }
 0x414   : > { %v1259_v32 = vadd.f32 1e-05, %v1258_v31 }
 0x416   : > { %1814 = vrsqrt.f32 %v1259_v32 }
 0x417   : > { %1816 = vrcp.f32 %v1371_v34 }
 0x420   : > { %v1815_v35 = vpop.eup %1814 }
 0x421   : > { %v1261_v37 = vmul.f32 %v1815_v35, %v1254_v28  ;;  %v1817_v41 = vpop.eup %1816 }
 0x423   : > { %v1268_v39 = vmul.f32 %v1547_v36, %v1261_v37 }
 0x425   : > { %v1275_v40 = vadd.f32 %v1548_v38, %v1268_v39 }
 0x427   : > { %vm1276_vm9 = vcmp.ge.f32.partialorder %v1275_v40, 0.0  ;;  %v1277_v42 = vmul.f32 %v1275_v40, %v2168_v54 }
 0x429   : > { %v1278_v43 = vsel %vm1276_vm9, %v1275_v40, %v1277_v42 }
 0x42a   : > { %v1374_v45 = vmul.f32 %v1817_v41, %v1278_v43 }
 0x42c   : > { %v1382_v46 = vmul.f32 %v1552_v44, %v1374_v45 }
 0x42e   : > { %1383 = vadd.xlane.f32.xlu0 %v1382_v46 }
 0x4bb   : > { %v1384_v48 = vpop.xlane.xlu0 %1383 }
 0x4bc   : > { %v1386_v49 = vadd.f32 %v1385_v47, %v1384_v48 }
 0x4be   : > { %v1553_v50 = vmul.f32 -1.442695, %v1386_v49 }
 0x4c0   : > { %1818 = vpow2.f32 %v1553_v50 }
 0x4ca   : > { %v1819_v51 = vpop.eup %1818 }
 0x4cb   : > { %v1390_v53 = vadd.f32 1.0, %v1819_v51 }
 0x4cd   : > { %1820 = vrcp.f32 %v1390_v53 }
 0x4d7   : > { %v1821_v54 = vpop.eup %1820 }
 0x4d8   : > { %1394 = vst.msk [vmem:[%s775_s24] sm:$0xff] %vm1393_vm10, %v1821_v54 }
 0x4d9 PF: > { %s34_s3 = sadd.s32 1, %s1879_s3  }
 0x4da   : > { %p31_p5 = scmp.ge.s32.totalorder %s34_s3, 4  }
 0x4dc   :  { %33 = sbr.rel (!%p31_p5) target bundleno = 10 (0xa), region = 160 }
 0x4e3   :  { %1414 = vsyncpa [#allocation3], 1 }
 0x4e4   :  { %1416 = vsyncpa [#allocation3 + $0x1], 1 }
 0x4e5   :  { %1417 = vsyncpa [#allocation4], 1 }
 0x4e6   :  { %1419 = vsyncpa [#allocation4 + $0x1], 1 }

</bundles_post_ra>
